<compile_context>
chip_gen: v7x
topology: tpu7x:2x2x1
jax: 0.10.0
libtpu: 0.0.40
codegen_flags: <defaults>
</compile_context>

<pallas_src>
import functools
import math

import jax
import jax.numpy as jnp
from jax import lax
from jax.experimental import pallas as pl
from jax.experimental.pallas import tpu as pltpu


# ----------------------------------------------------------------------------
# Activation (compile-time selected)
# ----------------------------------------------------------------------------
def _apply_act(x, act):
    if act == 'relu':
        return jnp.maximum(x, 0.0)
    if act == 'leakyrelu':
        return jnp.where(x >= 0.0, x, 0.01 * x)
    if act == 'elu':
        return jnp.where(x > 0.0, x, jnp.exp(jnp.minimum(x, 0.0)) - 1.0)
    if act == 'linear':
        return x
    raise ValueError('Unsupported activation type: ' + act)


def _resolve_compute_dtype(compute_dtype, k, cin, c_mid):
    if compute_dtype is not None:
        return jnp.dtype(compute_dtype)
    # bf16 operands only pay once the contraction (k*k*C) can load the MXU;
    # below that the extra casts are pure VPU cost (worst on v5e, no bf16 VPU).
    if k * k * min(cin, c_mid) >= 128:
        return jnp.dtype(jnp.bfloat16)
    return jnp.dtype(jnp.float32)


# ----------------------------------------------------------------------------
# Fused ConvBlock kernel: one grid step == `imgs` images, full H*W in VMEM.
# Layout inside the kernel: channels on sublanes, flattened H*W on lanes.
# ----------------------------------------------------------------------------
def _convblock_kernel(x_ref, w1_ref, b1_ref, w2_ref, b2_ref, o_ref,
                      p1_buf, p2_buf, *, imgs, H, W, K, dilation, pad,
                      act, pad_mode):
    HW = H * W
    cdt = p1_buf.dtype

    # Per-lane row/column indices of the flattened spatial axis.
    col = lax.broadcasted_iota(jnp.int32, (1, HW), 1) % W
    row = lax.broadcasted_iota(jnp.int32, (1, HW), 1) // W

    def gather_taps(src, p_buf, b):
        """src: (C, HW) value (one image). Writes the K*K shifted copies into
        p_buf[:, b*HW:(b+1)*HW] with lane-dense stores."""
        C = src.shape[0]
        for kh in range(K):
            sh = pad - kh * dilation                  # row shift
            for kw in range(K):
                sw = pad - kw * dilation              # column shift
                t = kh * K + kw
                if pad_mode == 'circular':
                    # 2-D circular shift on the flattened axis: one roll is
                    # correct except in the first `swm` columns of each row,
                    # which need the roll shifted by an extra -W.
                    swm = sw % W
                    s1 = (sh * W + swm) % HW
                    r1 = pltpu.roll(src, s1, 1) if s1 else src
                    if swm == 0:
                        tap = r1
                    else:
                        s2 = (s1 - W) % HW
                        r2 = pltpu.roll(src, s2, 1) if s2 else src
                        tap = jnp.where(col < swm, r2, r1)
                else:  # 'zeros': shift, then zero everything that wrapped.
                    s1 = (sh * W + sw) % HW
                    r1 = pltpu.roll(src, s1, 1) if s1 else src
                    valid = ((row >= sh) & (row < H + sh) &
                             (col >= sw) & (col < W + sw))
                    tap = jnp.where(valid, r1, jnp.zeros_like(r1))
                p_buf[t * C:(t + 1) * C, b * HW:(b + 1) * HW] = tap

    # ---- conv1: gather taps, ONE matmul over all images ---------------------
    for b in range(imgs):
        gather_taps(x_ref[0, b], p1_buf, b)
    f1 = jnp.dot(w1_ref[...], p1_buf[...],
                 preferred_element_type=jnp.float32)          # (c1, imgs*HW)
    f1 = _apply_act(f1 + b1_ref[...], act).astype(cdt)        # cast ONCE

    # ---- conv2: same gather on the (never-materialized-in-HBM) intermediate.
    for b in range(imgs):
        gather_taps(f1[:, b * HW:(b + 1) * HW], p2_buf, b)
    f2 = jnp.dot(w2_ref[...], p2_buf[...],
                 preferred_element_type=jnp.float32)          # (c2, imgs*HW)
    f2 = _apply_act(f2 + b2_ref[...], act)
    for b in range(imgs):
        o_ref[0, b] = f2[:, b * HW:(b + 1) * HW].astype(o_ref.dtype)


# ----------------------------------------------------------------------------
# Parameter init (PyTorch-like uniform fan-in); weights stored folded as
# (k*k*Cin, Cout), row index = (kh*k + kw)*Cin + cin.
# ----------------------------------------------------------------------------
def init_convblock(key, in_ch, out_ch, kernel_size=3):
    def conv_init(kw_key, kb_key, cin, cout, k):
        fan_in = cin * k * k
        bound = 1.0 / math.sqrt(fan_in)
        w = jax.random.uniform(kw_key, (k * k * cin, cout), jnp.float32,
                               -bound, bound)
        b = jax.random.uniform(kb_key, (cout,), jnp.float32, -bound, bound)
        return w, b

    k1, k2, k3, k4 = jax.random.split(key, 4)
    w1, b1 = conv_init(k1, k2, in_ch, out_ch, kernel_size)
    w2, b2 = conv_init(k3, k4, out_ch, out_ch, kernel_size)
    return {'w1': w1, 'b1': b1, 'w2': w2, 'b2': b2}


# ----------------------------------------------------------------------------
# Forward wrapper
# ----------------------------------------------------------------------------
def convblock_forward(params, x_nchw, *, kernel_size=3, dilation=1,
                      activation='ReLU', padding_mode='circular',
                      compute_dtype=None, out_dtype=jnp.float32,
                      images_per_step=None):
    if padding_mode not in ('circular', 'zeros'):
        # TODO(synk): 'reflect' / 'replicate' padding modes are not implemented.
        raise NotImplementedError(padding_mode)
    k, d = kernel_size, dilation
    if (d * (k - 1)) % 2 != 0:
        # TODO(synk): even effective kernels need asymmetric 'same' padding.
        raise NotImplementedError("even effective kernel size for 'same'")
    pad = d * (k - 1) // 2
    act = activation.lower()
    if act not in ('relu', 'elu', 'leakyrelu', 'linear'):
        raise ValueError('Unsupported activation type: ' + activation)

    w1, b1, w2, b2 = params['w1'], params['b1'], params['w2'], params['b2']
    n, cin, h, w_sz = x_nchw.shape
    c1, c2 = w1.shape[-1], w2.shape[-1]
    hw = h * w_sz
    cdt = _resolve_compute_dtype(compute_dtype, k, cin, c1)
    isz = jnp.dtype(cdt).itemsize
    osz = jnp.dtype(out_dtype).itemsize

    # ---- generation-aware VMEM budget (128 MiB v5e/v6e, 64 MiB/TC v7x) -----
    try:
        phys = int(pltpu.get_tpu_info().vmem_capacity_bytes)
    except Exception:
        phys = 64 << 20                      # conservative fallback
    vmem_cap = int(min(0.85 * phys, phys - (8 << 20)))

    fixed_bytes = (2 * isz * (k * k * cin * c1 + k * k * c1 * c2)
                   + 8 * (c1 + c2) + (4 << 20))
    per_img_bytes = hw * (2 * cin * isz + 2 * c2 * osz           # in/out blocks
                          + (k * k * cin + k * k * c1) * isz     # patch slabs
                          + 6 * max(cin, c1, c2) * 4)            # live values

    if images_per_step is None:
        # Largest divisor of n that fits VMEM while keeping grid length >= 2
        # (both v7x TensorCores busy; one extra step is noise on v5e/v6e).
        imgs = 1
        for cand in range(1, n + 1):
            if n % cand:
                continue
            if fixed_bytes + cand * per_img_bytes > vmem_cap:
                break
            if n // cand >= 2:
                imgs = cand
    else:
        imgs = int(images_per_step)
        assert n % imgs == 0, (n, imgs)
    g = n // imgs
    # TODO(synk): add a spatial (row-tile) grid axis when H*W alone overflows VMEM.
    vmem_limit = int(min(max(fixed_bytes + imgs * per_img_bytes, 16 << 20),
                         vmem_cap))

    # Host glue: pure reshape (no transpose) into (grid, imgs, cin, H*W).
    xr = x_nchw.reshape(g, imgs, cin, hw).astype(cdt)
    w1t = jnp.transpose(w1).astype(cdt)                  # (c1, k*k*cin)
    w2t = jnp.transpose(w2).astype(cdt)                  # (c2, k*k*c1)
    b1r = b1.reshape(c1, 1).astype(jnp.float32)
    b2r = b2.reshape(c2, 1).astype(jnp.float32)

    kernel = functools.partial(_convblock_kernel, imgs=imgs, H=h, W=w_sz,
                               K=k, dilation=d, pad=pad, act=act,
                               pad_mode=padding_mode)

    out = pl.pallas_call(
        kernel,
        out_shape=jax.ShapeDtypeStruct((g, imgs, c2, hw), out_dtype),
        grid=(g,),
        in_specs=[
            pl.BlockSpec((1, imgs, cin, hw), lambda i: (i, 0, 0, 0)),
            pl.BlockSpec((c1, k * k * cin), lambda i: (0, 0)),
            pl.BlockSpec((c1, 1), lambda i: (0, 0)),
            pl.BlockSpec((c2, k * k * c1), lambda i: (0, 0)),
            pl.BlockSpec((c2, 1), lambda i: (0, 0)),
        ],
        out_specs=pl.BlockSpec((1, imgs, c2, hw), lambda i: (i, 0, 0, 0)),
        scratch_shapes=[
            pltpu.VMEM((k * k * cin, imgs * hw), cdt),   # conv1 patch slab
            pltpu.VMEM((k * k * c1, imgs * hw), cdt),    # conv2 patch slab
        ],
        compiler_params=pltpu.CompilerParams(
            dimension_semantics=("parallel",),
            vmem_limit_bytes=vmem_limit),
    )(xr, w1t, b1r, w2t, b2r)

    return out.reshape(n, c2, h, w_sz)      # NCHW, like the PyTorch module


# ----------------------------------------------------------------------------
# Pure-JAX reference (same compute-dtype quantization of matmul operands)
# ----------------------------------------------------------------------------
def convblock_reference(params, x_nchw, *, kernel_size=3, dilation=1,
                        activation='ReLU', padding_mode='circular',
                        compute_dtype=None):
    k, d = kernel_size, dilation
    pad = d * (k - 1) // 2
    act = activation.lower()
    cin = x_nchw.shape[1]
    c1 = params['w1'].shape[-1]
    cdt = _resolve_compute_dtype(compute_dtype, k, cin, c1)
    mode = 'wrap' if padding_mode == 'circular' else 'constant'
    q = lambda a: a.astype(cdt).astype(jnp.float32)

    def conv(x_nhwc, w_flat, b):
        ci, co = x_nhwc.shape[-1], w_flat.shape[-1]
        xpad = jnp.pad(x_nhwc, ((0, 0), (pad, pad), (pad, pad), (0, 0)),
                       mode=mode)
        w4 = w_flat.reshape(k, k, ci, co)
        y = lax.conv_general_dilated(
            q(xpad), q(w4), window_strides=(1, 1), padding='VALID',
            rhs_dilation=(d, d), dimension_numbers=('NHWC', 'HWIO', 'NHWC'),
            precision=lax.Precision.HIGHEST,
            preferred_element_type=jnp.float32)
        return y + b.reshape(1, 1, 1, co)

    x_nhwc = jnp.transpose(x_nchw, (0, 2, 3, 1)).astype(jnp.float32)
    f = _apply_act(conv(x_nhwc, params['w1'], params['b1']), act)
    f = _apply_act(conv(f, params['w2'], params['b2']), act)
    return jnp.transpose(f, (0, 3, 1, 2))


if __name__ == "__main__":
    key = jax.random.PRNGKey(0)
    kp, kx = jax.random.split(key)

    # ConvBlock(in_ch=4, out_ch=8, activation='ReLU', kernel_size=3,
    #           dilation=1, padding_mode='circular')
    N, in_ch, out_ch, H, W = 2, 4, 8, 16, 16
    params = init_convblock(kp, in_ch, out_ch, kernel_size=3)
    x = jax.random.normal(kx, (N, in_ch, H, W), jnp.float32)   # NCHW like torch

    fwd = jax.jit(functools.partial(
        convblock_forward, kernel_size=3, dilation=1, activation='ReLU',
        padding_mode='circular'))
    out = jax.block_until_ready(fwd(params, x))
    assert out.shape == (N, out_ch, H, W), out.shape

    ref = jax.block_until_ready(convblock_reference(
        params, x, kernel_size=3, dilation=1, activation='ReLU',
        padding_mode='circular'))
    max_err = float(jnp.max(jnp.abs(out - ref)))
    assert jnp.allclose(out, ref, atol=1e-2, rtol=1e-2), max_err

    print("KERNEL_OK")
</pallas_src>

<mosaic_0001>
module attributes {stable_mosaic.version = 11 : i64} {
  func.func @_convblock_kernel(%arg0: i32, %arg1: memref<1x1x4x256xf32, #tpu.memory_space<vmem>>, %arg2: memref<8x36xf32, #tpu.memory_space<vmem>>, %arg3: memref<8x1xf32, #tpu.memory_space<vmem>>, %arg4: memref<8x72xf32, #tpu.memory_space<vmem>>, %arg5: memref<8x1xf32, #tpu.memory_space<vmem>>, %arg6: memref<1x1x8x256xf32, #tpu.memory_space<vmem>>, %arg7: memref<36x256xf32, #tpu.memory_space<vmem>>, %arg8: memref<72x256xf32, #tpu.memory_space<vmem>>) attributes {dimension_semantics = [#tpu.dimension_semantics<parallel>], iteration_bounds = array<i64: 2>, scalar_prefetch = 0 : i64, scratch_operands = 2 : i64, tpu.core_type = #tpu.core_type<tc>, window_params = [{transform_indices = @transform_0, window_bounds = array<i64: 1, 1, 4, 256>}, {pipeline_mode = #tpu.pipeline_mode<synchronous>, transform_indices = @transform_1, window_bounds = array<i64: 8, 36>}, {pipeline_mode = #tpu.pipeline_mode<synchronous>, transform_indices = @transform_2, window_bounds = array<i64: 8, 1>}, {pipeline_mode = #tpu.pipeline_mode<synchronous>, transform_indices = @transform_3, window_bounds = array<i64: 8, 72>}, {pipeline_mode = #tpu.pipeline_mode<synchronous>, transform_indices = @transform_4, window_bounds = array<i64: 8, 1>}, {transform_indices = @transform_5, window_bounds = array<i64: 1, 1, 8, 256>}]} {
    %0 = tpu.iota {dimensions = array<i32: 1>} : vector<1x256xi32>
    %c16_i32 = arith.constant 16 : i32
    %c0_i32 = arith.constant 0 : i32
    %1 = arith.cmpi eq, %c16_i32, %c0_i32 : i32
    %c1_i32 = arith.constant 1 : i32
    %2 = arith.select %1, %c1_i32, %c16_i32 : i32
    %3 = vector.broadcast %2 : i32 to vector<1x256xi32>
    %4 = arith.remsi %0, %3 : vector<1x256xi32>
    %c0_i32_0 = arith.constant 0 : i32
    %5 = vector.broadcast %c0_i32_0 : i32 to vector<1x256xi32>
    %6 = arith.cmpi ne, %4, %5 : vector<1x256xi32>
    %c0_i32_1 = arith.constant 0 : i32
    %7 = vector.broadcast %c0_i32_1 : i32 to vector<1x256xi32>
    %8 = arith.cmpi slt, %4, %7 : vector<1x256xi32>
    %c0_i32_2 = arith.constant 0 : i32
    %9 = arith.cmpi slt, %2, %c0_i32_2 : i32
    %10 = vector.broadcast %9 : i1 to vector<1x256xi1>
    %11 = vector.broadcast %10 : vector<1x256xi1> to vector<1x256xi1>
    %12 = arith.xori %8, %11 : vector<1x256xi1>
    %13 = arith.andi %12, %6 : vector<1x256xi1>
    %14 = vector.broadcast %2 : i32 to vector<1x256xi32>
    %15 = arith.addi %4, %14 : vector<1x256xi32>
    %16 = arith.select %13, %15, %4 : vector<1x256xi1>, vector<1x256xi32>
    %c0 = arith.constant 0 : index
    %c0_3 = arith.constant 0 : index
    %c0_4 = arith.constant 0 : index
    %c0_5 = arith.constant 0 : index
    %17 = vector.load %arg1[%c0, %c0_3, %c0_4, %c0_5] : memref<1x1x4x256xf32, #tpu.memory_space<vmem>>, vector<1x1x4x256xf32>
    %18 = vector.shape_cast %17 : vector<1x1x4x256xf32> to vector<4x256xf32>
    %c17_i32 = arith.constant 17 : i32
    %19 = tpu.dynamic_rotate %18 by %c17_i32 dim 1 : vector<4x256xf32>, i32 -> vector<4x256xf32>
    %c1_i32_6 = arith.constant 1 : i32
    %20 = tpu.dynamic_rotate %18 by %c1_i32_6 dim 1 : vector<4x256xf32>, i32 -> vector<4x256xf32>
    %c1_i32_7 = arith.constant 1 : i32
    %21 = vector.broadcast %c1_i32_7 : i32 to vector<1x256xi32>
    %22 = arith.cmpi slt, %16, %21 : vector<1x256xi32>
    %23 = vector.shape_cast %22 : vector<1x256xi1> to vector<1x256xi1>
    %24 = vector.broadcast %23 : vector<1x256xi1> to vector<4x256xi1>
    %25 = arith.select %24, %20, %19 : vector<4x256xi1>, vector<4x256xf32>
    %c0_8 = arith.constant 0 : index
    %c0_9 = arith.constant 0 : index
    %26 = vector.load %arg7[%c0_8, %c0_9] : memref<36x256xf32, #tpu.memory_space<vmem>>, vector<4x256xf32>
    tpu.vector_store %arg7[%c0_8, %c0_9], %25 {strides = array<i32>} : memref<36x256xf32, #tpu.memory_space<vmem>>, vector<4x256xf32>,
    %c16_i32_10 = arith.constant 16 : i32
    %27 = tpu.dynamic_rotate %18 by %c16_i32_10 dim 1 : vector<4x256xf32>, i32 -> vector<4x256xf32>
    %c4 = arith.constant 4 : index
    %c0_11 = arith.constant 0 : index
    %28 = vector.load %arg7[%c4, %c0_11] : memref<36x256xf32, #tpu.memory_space<vmem>>, vector<4x256xf32>
    tpu.vector_store %arg7[%c4, %c0_11], %27 {strides = array<i32>} : memref<36x256xf32, #tpu.memory_space<vmem>>, vector<4x256xf32>,
    %c31_i32 = arith.constant 31 : i32
    %29 = tpu.dynamic_rotate %18 by %c31_i32 dim 1 : vector<4x256xf32>, i32 -> vector<4x256xf32>
    %c15_i32 = arith.constant 15 : i32
    %30 = tpu.dynamic_rotate %18 by %c15_i32 dim 1 : vector<4x256xf32>, i32 -> vector<4x256xf32>
    %c15_i32_12 = arith.constant 15 : i32
    %31 = vector.broadcast %c15_i32_12 : i32 to vector<1x256xi32>
    %32 = arith.cmpi slt, %16, %31 : vector<1x256xi32>
    %33 = vector.shape_cast %32 : vector<1x256xi1> to vector<1x256xi1>
    %34 = vector.broadcast %33 : vector<1x256xi1> to vector<4x256xi1>
    %35 = arith.select %34, %30, %29 : vector<4x256xi1>, vector<4x256xf32>
    %c8 = arith.constant 8 : index
    %c0_13 = arith.constant 0 : index
    %36 = vector.load %arg7[%c8, %c0_13] : memref<36x256xf32, #tpu.memory_space<vmem>>, vector<4x256xf32>
    tpu.vector_store %arg7[%c8, %c0_13], %35 {strides = array<i32>} : memref<36x256xf32, #tpu.memory_space<vmem>>, vector<4x256xf32>,
    %c1_i32_14 = arith.constant 1 : i32
    %37 = tpu.dynamic_rotate %18 by %c1_i32_14 dim 1 : vector<4x256xf32>, i32 -> vector<4x256xf32>
    %c241_i32 = arith.constant 241 : i32
    %38 = tpu.dynamic_rotate %18 by %c241_i32 dim 1 : vector<4x256xf32>, i32 -> vector<4x256xf32>
    %c1_i32_15 = arith.constant 1 : i32
    %39 = vector.broadcast %c1_i32_15 : i32 to vector<1x256xi32>
    %40 = arith.cmpi slt, %16, %39 : vector<1x256xi32>
    %41 = vector.shape_cast %40 : vector<1x256xi1> to vector<1x256xi1>
    %42 = vector.broadcast %41 : vector<1x256xi1> to vector<4x256xi1>
    %43 = arith.select %42, %38, %37 : vector<4x256xi1>, vector<4x256xf32>
    %c12 = arith.constant 12 : index
    %c0_16 = arith.constant 0 : index
    %44 = vector.load %arg7[%c12, %c0_16] : memref<36x256xf32, #tpu.memory_space<vmem>>, vector<4x256xf32>
    tpu.vector_store %arg7[%c12, %c0_16], %43 {strides = array<i32>} : memref<36x256xf32, #tpu.memory_space<vmem>>, vector<4x256xf32>,
    %c16 = arith.constant 16 : index
    %c0_17 = arith.constant 0 : index
    %45 = vector.load %arg7[%c16, %c0_17] : memref<36x256xf32, #tpu.memory_space<vmem>>, vector<4x256xf32>
    tpu.vector_store %arg7[%c16, %c0_17], %18 {strides = array<i32>} : memref<36x256xf32, #tpu.memory_space<vmem>>, vector<4x256xf32>,
    %c15_i32_18 = arith.constant 15 : i32
    %46 = tpu.dynamic_rotate %18 by %c15_i32_18 dim 1 : vector<4x256xf32>, i32 -> vector<4x256xf32>
    %c255_i32 = arith.constant 255 : i32
    %47 = tpu.dynamic_rotate %18 by %c255_i32 dim 1 : vector<4x256xf32>, i32 -> vector<4x256xf32>
    %c15_i32_19 = arith.constant 15 : i32
    %48 = vector.broadcast %c15_i32_19 : i32 to vector<1x256xi32>
    %49 = arith.cmpi slt, %16, %48 : vector<1x256xi32>
    %50 = vector.shape_cast %49 : vector<1x256xi1> to vector<1x256xi1>
    %51 = vector.broadcast %50 : vector<1x256xi1> to vector<4x256xi1>
    %52 = arith.select %51, %47, %46 : vector<4x256xi1>, vector<4x256xf32>
    %c20 = arith.constant 20 : index
    %c0_20 = arith.constant 0 : index
    %53 = vector.load %arg7[%c20, %c0_20] : memref<36x256xf32, #tpu.memory_space<vmem>>, vector<4x256xf32>
    tpu.vector_store %arg7[%c20, %c0_20], %52 {strides = array<i32>} : memref<36x256xf32, #tpu.memory_space<vmem>>, vector<4x256xf32>,
    %c241_i32_21 = arith.constant 241 : i32
    %54 = tpu.dynamic_rotate %18 by %c241_i32_21 dim 1 : vector<4x256xf32>, i32 -> vector<4x256xf32>
    %c225_i32 = arith.constant 225 : i32
    %55 = tpu.dynamic_rotate %18 by %c225_i32 dim 1 : vector<4x256xf32>, i32 -> vector<4x256xf32>
    %c1_i32_22 = arith.constant 1 : i32
    %56 = vector.broadcast %c1_i32_22 : i32 to vector<1x256xi32>
    %57 = arith.cmpi slt, %16, %56 : vector<1x256xi32>
    %58 = vector.shape_cast %57 : vector<1x256xi1> to vector<1x256xi1>
    %59 = vector.broadcast %58 : vector<1x256xi1> to vector<4x256xi1>
    %60 = arith.select %59, %55, %54 : vector<4x256xi1>, vector<4x256xf32>
    %c24 = arith.constant 24 : index
    %c0_23 = arith.constant 0 : index
    %61 = vector.load %arg7[%c24, %c0_23] : memref<36x256xf32, #tpu.memory_space<vmem>>, vector<4x256xf32>
    tpu.vector_store %arg7[%c24, %c0_23], %60 {strides = array<i32>} : memref<36x256xf32, #tpu.memory_space<vmem>>, vector<4x256xf32>,
    %c240_i32 = arith.constant 240 : i32
    %62 = tpu.dynamic_rotate %18 by %c240_i32 dim 1 : vector<4x256xf32>, i32 -> vector<4x256xf32>
    %c28 = arith.constant 28 : index
    %c0_24 = arith.constant 0 : index
    %63 = vector.load %arg7[%c28, %c0_24] : memref<36x256xf32, #tpu.memory_space<vmem>>, vector<4x256xf32>
    tpu.vector_store %arg7[%c28, %c0_24], %62 {strides = array<i32>} : memref<36x256xf32, #tpu.memory_space<vmem>>, vector<4x256xf32>,
    %c255_i32_25 = arith.constant 255 : i32
    %64 = tpu.dynamic_rotate %18 by %c255_i32_25 dim 1 : vector<4x256xf32>, i32 -> vector<4x256xf32>
    %c239_i32 = arith.constant 239 : i32
    %65 = tpu.dynamic_rotate %18 by %c239_i32 dim 1 : vector<4x256xf32>, i32 -> vector<4x256xf32>
    %c15_i32_26 = arith.constant 15 : i32
    %66 = vector.broadcast %c15_i32_26 : i32 to vector<1x256xi32>
    %67 = arith.cmpi slt, %16, %66 : vector<1x256xi32>
    %68 = vector.shape_cast %67 : vector<1x256xi1> to vector<1x256xi1>
    %69 = vector.broadcast %68 : vector<1x256xi1> to vector<4x256xi1>
    %70 = arith.select %69, %65, %64 : vector<4x256xi1>, vector<4x256xf32>
    %c32 = arith.constant 32 : index
    %c0_27 = arith.constant 0 : index
    %71 = vector.load %arg7[%c32, %c0_27] : memref<36x256xf32, #tpu.memory_space<vmem>>, vector<4x256xf32>
    tpu.vector_store %arg7[%c32, %c0_27], %70 {strides = array<i32>} : memref<36x256xf32, #tpu.memory_space<vmem>>, vector<4x256xf32>,
    %c0_28 = arith.constant 0 : index
    %c0_29 = arith.constant 0 : index
    %72 = vector.load %arg2[%c0_28, %c0_29] : memref<8x36xf32, #tpu.memory_space<vmem>>, vector<8x36xf32>
    %c0_30 = arith.constant 0 : index
    %c0_31 = arith.constant 0 : index
    %73 = vector.load %arg7[%c0_30, %c0_31] : memref<36x256xf32, #tpu.memory_space<vmem>>, vector<36x256xf32>
    %cst = arith.constant dense<0.000000e+00> : vector<8x256xf32>
    %74 = tpu.matmul %72, %73, %cst {dimension_numbers = #tpu.dot_dimension_numbers<[1], [0], [0], [1], [0, 0, 1, 1], [], []>} : vector<8x36xf32>, vector<36x256xf32>, vector<8x256xf32> -> vector<8x256xf32>
    %c0_32 = arith.constant 0 : index
    %c0_33 = arith.constant 0 : index
    %75 = vector.load %arg3[%c0_32, %c0_33] : memref<8x1xf32, #tpu.memory_space<vmem>>, vector<8x1xf32>
    %76 = vector.broadcast %75 : vector<8x1xf32> to vector<8x256xf32>
    %77 = arith.addf %74, %76 : vector<8x256xf32>
    %cst_34 = arith.constant 0.000000e+00 : f32
    %78 = vector.broadcast %cst_34 : f32 to vector<8x256xf32>
    %79 = arith.maximumf %77, %78 : vector<8x256xf32>
    %c17_i32_35 = arith.constant 17 : i32
    %80 = tpu.dynamic_rotate %79 by %c17_i32_35 dim 1 : vector<8x256xf32>, i32 -> vector<8x256xf32>
    %c1_i32_36 = arith.constant 1 : i32
    %81 = tpu.dynamic_rotate %79 by %c1_i32_36 dim 1 : vector<8x256xf32>, i32 -> vector<8x256xf32>
    %c1_i32_37 = arith.constant 1 : i32
    %82 = vector.broadcast %c1_i32_37 : i32 to vector<1x256xi32>
    %83 = arith.cmpi slt, %16, %82 : vector<1x256xi32>
    %84 = vector.shape_cast %83 : vector<1x256xi1> to vector<1x256xi1>
    %85 = vector.broadcast %84 : vector<1x256xi1> to vector<8x256xi1>
    %86 = arith.select %85, %81, %80 : vector<8x256xi1>, vector<8x256xf32>
    %c0_38 = arith.constant 0 : index
    %c0_39 = arith.constant 0 : index
    %87 = vector.load %arg8[%c0_38, %c0_39] : memref<72x256xf32, #tpu.memory_space<vmem>>, vector<8x256xf32>
    tpu.vector_store %arg8[%c0_38, %c0_39], %86 {strides = array<i32>} : memref<72x256xf32, #tpu.memory_space<vmem>>, vector<8x256xf32>,
    %c16_i32_40 = arith.constant 16 : i32
    %88 = tpu.dynamic_rotate %79 by %c16_i32_40 dim 1 : vector<8x256xf32>, i32 -> vector<8x256xf32>
    %c8_41 = arith.constant 8 : index
    %c0_42 = arith.constant 0 : index
    %89 = vector.load %arg8[%c8_41, %c0_42] : memref<72x256xf32, #tpu.memory_space<vmem>>, vector<8x256xf32>
    tpu.vector_store %arg8[%c8_41, %c0_42], %88 {strides = array<i32>} : memref<72x256xf32, #tpu.memory_space<vmem>>, vector<8x256xf32>,
    %c31_i32_43 = arith.constant 31 : i32
    %90 = tpu.dynamic_rotate %79 by %c31_i32_43 dim 1 : vector<8x256xf32>, i32 -> vector<8x256xf32>
    %c15_i32_44 = arith.constant 15 : i32
    %91 = tpu.dynamic_rotate %79 by %c15_i32_44 dim 1 : vector<8x256xf32>, i32 -> vector<8x256xf32>
    %c15_i32_45 = arith.constant 15 : i32
    %92 = vector.broadcast %c15_i32_45 : i32 to vector<1x256xi32>
    %93 = arith.cmpi slt, %16, %92 : vector<1x256xi32>
    %94 = vector.shape_cast %93 : vector<1x256xi1> to vector<1x256xi1>
    %95 = vector.broadcast %94 : vector<1x256xi1> to vector<8x256xi1>
    %96 = arith.select %95, %91, %90 : vector<8x256xi1>, vector<8x256xf32>
    %c16_46 = arith.constant 16 : index
    %c0_47 = arith.constant 0 : index
    %97 = vector.load %arg8[%c16_46, %c0_47] : memref<72x256xf32, #tpu.memory_space<vmem>>, vector<8x256xf32>
    tpu.vector_store %arg8[%c16_46, %c0_47], %96 {strides = array<i32>} : memref<72x256xf32, #tpu.memory_space<vmem>>, vector<8x256xf32>,
    %c1_i32_48 = arith.constant 1 : i32
    %98 = tpu.dynamic_rotate %79 by %c1_i32_48 dim 1 : vector<8x256xf32>, i32 -> vector<8x256xf32>
    %c241_i32_49 = arith.constant 241 : i32
    %99 = tpu.dynamic_rotate %79 by %c241_i32_49 dim 1 : vector<8x256xf32>, i32 -> vector<8x256xf32>
    %c1_i32_50 = arith.constant 1 : i32
    %100 = vector.broadcast %c1_i32_50 : i32 to vector<1x256xi32>
    %101 = arith.cmpi slt, %16, %100 : vector<1x256xi32>
    %102 = vector.shape_cast %101 : vector<1x256xi1> to vector<1x256xi1>
    %103 = vector.broadcast %102 : vector<1x256xi1> to vector<8x256xi1>
    %104 = arith.select %103, %99, %98 : vector<8x256xi1>, vector<8x256xf32>
    %c24_51 = arith.constant 24 : index
    %c0_52 = arith.constant 0 : index
    %105 = vector.load %arg8[%c24_51, %c0_52] : memref<72x256xf32, #tpu.memory_space<vmem>>, vector<8x256xf32>
    tpu.vector_store %arg8[%c24_51, %c0_52], %104 {strides = array<i32>} : memref<72x256xf32, #tpu.memory_space<vmem>>, vector<8x256xf32>,
    %c32_53 = arith.constant 32 : index
    %c0_54 = arith.constant 0 : index
    %106 = vector.load %arg8[%c32_53, %c0_54] : memref<72x256xf32, #tpu.memory_space<vmem>>, vector<8x256xf32>
    tpu.vector_store %arg8[%c32_53, %c0_54], %79 {strides = array<i32>} : memref<72x256xf32, #tpu.memory_space<vmem>>, vector<8x256xf32>,
    %c15_i32_55 = arith.constant 15 : i32
    %107 = tpu.dynamic_rotate %79 by %c15_i32_55 dim 1 : vector<8x256xf32>, i32 -> vector<8x256xf32>
    %c255_i32_56 = arith.constant 255 : i32
    %108 = tpu.dynamic_rotate %79 by %c255_i32_56 dim 1 : vector<8x256xf32>, i32 -> vector<8x256xf32>
    %c15_i32_57 = arith.constant 15 : i32
    %109 = vector.broadcast %c15_i32_57 : i32 to vector<1x256xi32>
    %110 = arith.cmpi slt, %16, %109 : vector<1x256xi32>
    %111 = vector.shape_cast %110 : vector<1x256xi1> to vector<1x256xi1>
    %112 = vector.broadcast %111 : vector<1x256xi1> to vector<8x256xi1>
    %113 = arith.select %112, %108, %107 : vector<8x256xi1>, vector<8x256xf32>
    %c40 = arith.constant 40 : index
    %c0_58 = arith.constant 0 : index
    %114 = vector.load %arg8[%c40, %c0_58] : memref<72x256xf32, #tpu.memory_space<vmem>>, vector<8x256xf32>
    tpu.vector_store %arg8[%c40, %c0_58], %113 {strides = array<i32>} : memref<72x256xf32, #tpu.memory_space<vmem>>, vector<8x256xf32>,
    %c241_i32_59 = arith.constant 241 : i32
    %115 = tpu.dynamic_rotate %79 by %c241_i32_59 dim 1 : vector<8x256xf32>, i32 -> vector<8x256xf32>
    %c225_i32_60 = arith.constant 225 : i32
    %116 = tpu.dynamic_rotate %79 by %c225_i32_60 dim 1 : vector<8x256xf32>, i32 -> vector<8x256xf32>
    %c1_i32_61 = arith.constant 1 : i32
    %117 = vector.broadcast %c1_i32_61 : i32 to vector<1x256xi32>
    %118 = arith.cmpi slt, %16, %117 : vector<1x256xi32>
    %119 = vector.shape_cast %118 : vector<1x256xi1> to vector<1x256xi1>
    %120 = vector.broadcast %119 : vector<1x256xi1> to vector<8x256xi1>
    %121 = arith.select %120, %116, %115 : vector<8x256xi1>, vector<8x256xf32>
    %c48 = arith.constant 48 : index
    %c0_62 = arith.constant 0 : index
    %122 = vector.load %arg8[%c48, %c0_62] : memref<72x256xf32, #tpu.memory_space<vmem>>, vector<8x256xf32>
    tpu.vector_store %arg8[%c48, %c0_62], %121 {strides = array<i32>} : memref<72x256xf32, #tpu.memory_space<vmem>>, vector<8x256xf32>,
    %c240_i32_63 = arith.constant 240 : i32
    %123 = tpu.dynamic_rotate %79 by %c240_i32_63 dim 1 : vector<8x256xf32>, i32 -> vector<8x256xf32>
    %c56 = arith.constant 56 : index
    %c0_64 = arith.constant 0 : index
    %124 = vector.load %arg8[%c56, %c0_64] : memref<72x256xf32, #tpu.memory_space<vmem>>, vector<8x256xf32>
    tpu.vector_store %arg8[%c56, %c0_64], %123 {strides = array<i32>} : memref<72x256xf32, #tpu.memory_space<vmem>>, vector<8x256xf32>,
    %c255_i32_65 = arith.constant 255 : i32
    %125 = tpu.dynamic_rotate %79 by %c255_i32_65 dim 1 : vector<8x256xf32>, i32 -> vector<8x256xf32>
    %c239_i32_66 = arith.constant 239 : i32
    %126 = tpu.dynamic_rotate %79 by %c239_i32_66 dim 1 : vector<8x256xf32>, i32 -> vector<8x256xf32>
    %c15_i32_67 = arith.constant 15 : i32
    %127 = vector.broadcast %c15_i32_67 : i32 to vector<1x256xi32>
    %128 = arith.cmpi slt, %16, %127 : vector<1x256xi32>
    %129 = vector.shape_cast %128 : vector<1x256xi1> to vector<1x256xi1>
    %130 = vector.broadcast %129 : vector<1x256xi1> to vector<8x256xi1>
    %131 = arith.select %130, %126, %125 : vector<8x256xi1>, vector<8x256xf32>
    %c64 = arith.constant 64 : index
    %c0_68 = arith.constant 0 : index
    %132 = vector.load %arg8[%c64, %c0_68] : memref<72x256xf32, #tpu.memory_space<vmem>>, vector<8x256xf32>
    tpu.vector_store %arg8[%c64, %c0_68], %131 {strides = array<i32>} : memref<72x256xf32, #tpu.memory_space<vmem>>, vector<8x256xf32>,
    %c0_69 = arith.constant 0 : index
    %c0_70 = arith.constant 0 : index
    %133 = vector.load %arg4[%c0_69, %c0_70] : memref<8x72xf32, #tpu.memory_space<vmem>>, vector<8x72xf32>
    %c0_71 = arith.constant 0 : index
    %c0_72 = arith.constant 0 : index
    %134 = vector.load %arg8[%c0_71, %c0_72] : memref<72x256xf32, #tpu.memory_space<vmem>>, vector<72x256xf32>
    %cst_73 = arith.constant dense<0.000000e+00> : vector<8x256xf32>
    %135 = tpu.matmul %133, %134, %cst_73 {dimension_numbers = #tpu.dot_dimension_numbers<[1], [0], [0], [1], [0, 0, 1, 1], [], []>} : vector<8x72xf32>, vector<72x256xf32>, vector<8x256xf32> -> vector<8x256xf32>
    %c0_74 = arith.constant 0 : index
    %c0_75 = arith.constant 0 : index
    %136 = vector.load %arg5[%c0_74, %c0_75] : memref<8x1xf32, #tpu.memory_space<vmem>>, vector<8x1xf32>
    %137 = vector.broadcast %136 : vector<8x1xf32> to vector<8x256xf32>
    %138 = arith.addf %135, %137 : vector<8x256xf32>
    %cst_76 = arith.constant 0.000000e+00 : f32
    %139 = vector.broadcast %cst_76 : f32 to vector<8x256xf32>
    %140 = arith.maximumf %138, %139 : vector<8x256xf32>
    %c0_77 = arith.constant 0 : index
    %c0_78 = arith.constant 0 : index
    %c0_79 = arith.constant 0 : index
    %c0_80 = arith.constant 0 : index
    %141 = vector.load %arg6[%c0_77, %c0_78, %c0_79, %c0_80] : memref<1x1x8x256xf32, #tpu.memory_space<vmem>>, vector<1x1x8x256xf32>
    %142 = vector.shape_cast %141 : vector<1x1x8x256xf32> to vector<8x256xf32>
    %143 = vector.shape_cast %140 : vector<8x256xf32> to vector<1x1x8x256xf32>
    tpu.vector_store %arg6[%c0_77, %c0_78, %c0_79, %c0_80], %143 {strides = array<i32>} : memref<1x1x8x256xf32, #tpu.memory_space<vmem>>, vector<1x1x8x256xf32>,
    return
  }
  func.func @transform_0(%arg0: i32) -> (i32, i32, i32, i32) {
    %c0_i32 = arith.constant 0 : i32
    %c0_i32_0 = arith.constant 0 : i32
    %c0_i32_1 = arith.constant 0 : i32
    %c0_i32_2 = arith.constant 0 : i32
    return %arg0, %c0_i32, %c0_i32_0, %c0_i32_1 : i32, i32, i32, i32
  }
  func.func @transform_1(%arg0: i32) -> (i32, i32) {
    %c0_i32 = arith.constant 0 : i32
    %c0_i32_0 = arith.constant 0 : i32
    %c0_i32_1 = arith.constant 0 : i32
    return %c0_i32, %c0_i32_0 : i32, i32
  }
  func.func @transform_2(%arg0: i32) -> (i32, i32) {
    %c0_i32 = arith.constant 0 : i32
    %c0_i32_0 = arith.constant 0 : i32
    %c0_i32_1 = arith.constant 0 : i32
    return %c0_i32, %c0_i32_0 : i32, i32
  }
  func.func @transform_3(%arg0: i32) -> (i32, i32) {
    %c0_i32 = arith.constant 0 : i32
    %c0_i32_0 = arith.constant 0 : i32
    %c0_i32_1 = arith.constant 0 : i32
    return %c0_i32, %c0_i32_0 : i32, i32
  }
  func.func @transform_4(%arg0: i32) -> (i32, i32) {
    %c0_i32 = arith.constant 0 : i32
    %c0_i32_0 = arith.constant 0 : i32
    %c0_i32_1 = arith.constant 0 : i32
    return %c0_i32, %c0_i32_0 : i32, i32
  }
  func.func @transform_5(%arg0: i32) -> (i32, i32, i32, i32) {
    %c0_i32 = arith.constant 0 : i32
    %c0_i32_0 = arith.constant 0 : i32
    %c0_i32_1 = arith.constant 0 : i32
    %c0_i32_2 = arith.constant 0 : i32
    return %arg0, %c0_i32, %c0_i32_0, %c0_i32_1 : i32, i32, i32, i32
  }
}

</mosaic_0001>

<bundles_post_ra>
// kernel: convblock_forward.1
= control target key start
LH: loop header
LB: loop body
LE: loop exit
PB: predicated region body
PF: predicated region fallthrough
CT: control target
= control target key end

     0   :  { %s895_s18 = smov 0   ;;  %s1138_s0 = inlined_call_operand.vmem [shape: f32[2,1,4,256], index: 0, kind: input, shape index: {}]   ;;  %s1139_s1 = inlined_call_operand.vmem [shape: f32[8,36], index: 1, kind: input, shape index: {}]   ;;  %s1140_s2 = inlined_call_operand.vmem [shape: f32[8,1], index: 2, kind: input, shape index: {}]   ;;  %s1141_s3 = inlined_call_operand.vmem [shape: f32[8,72], index: 3, kind: input, shape index: {}]   ;;  %s1142_s4 = inlined_call_operand.vmem [shape: f32[8,1], index: 4, kind: input, shape index: {}]   ;;  %s1143_s5 = inlined_call_operand.vmem [shape: f32[2,1,8,256], index: 5, kind: output, shape index: {}]  }
   0x1 LB: > { %s742_s19 = sadd.s32 4294967295, %s851_s18   ;;  %p746_p0 = scmp.ge.s32.totalorder %s851_s18, 1  ;;  %s851_s18 = sphi %s895_s18, %s15_s18  }
   0x2   : > { %p187_p1 = scmp.lt.s32.totalorder %s851_s18, 3 }
   0x4   : > { %p188_p2 = pnand %p746_p0, %p187_p1 }
   0x5   : > { %p215_p3 = scmp.lt.s32.totalorder (!%p188_p2), %s742_s19, 1  ;;  %s853_s24 = smov (!%p188_p2), 113   ;;  %v863_v2 = vmov (!%p188_p2), 0.0   ;;  %v403_v3 = vld [vmem:[%s1140_s2] sm:$0xff] (!%p188_p2)  ;;  %v864_v4 = vmov (!%p188_p2), 0   ;;  %v225_v5 = vlaneseq (!%p188_p2)  ;;  %vm413_vm14 = vcmask (!%p188_p2), 1043456  }
   0x6   : > { %191 = sbr.rel (%p188_p2) target bundleno = 766 (0x2fe), region = 40  ;;  %s854_s25 = smov (!%p188_p2), 1   ;;  %484 = vmatprep.mubr.f32.mxu0 (!%p188_p2), %v863_v2  ;;  %676 = vmatprep.mubr.f32.mxu1 (!%p188_p2), %v863_v2  ;;  %vm409_vm15 = vcmask (!%p188_p2), 293888  }
   0x7   : > { %s855_s26 = smov (!%p188_p2), 16   ;;  %s856_s27 = smov (!%p188_p2), 17   ;;  %803 = vset.pattern.permute.xlu0 (!%p188_p2), %v864_v4  ;;  %v932_v6 = vand.u32 (!%p188_p2), 127, %v225_v5 }
   0x8   : > { %s857_s28 = smov (!%p188_p2), 31   ;;  %s858_s29 = smov (!%p188_p2), 15  }
   0x9   : > { %s859_s30 = smov (!%p188_p2), 127   ;;  %s860_s6 = smov (!%p188_p2), 112   ;;  %v227_v7 = vadd.s32 (!%p188_p2), 128, %v932_v6  ;;  %v232_v10 = vand.u32 (!%p188_p2), 15, %v932_v6  ;;  %vm323_vm0 = vcmp.lt.s32.totalorder (!%p188_p2), %v932_v6, 113  ;;  %vm284_vm1 = vcmp.lt.s32.totalorder (!%p188_p2), %v932_v6, 16 }
   0xa   : > { %s861_s7 = smov (!%p188_p2), 97   ;;  %s862_s8 = smov (!%p188_p2), 111   ;;  %vm267_vm2 = vcmp.lt.s32.totalorder (!%p188_p2), %v932_v6, 1  ;;  %vm260_vm5 = vcmp.lt.s32.totalorder (!%p188_p2), %v932_v6, 17  ;;  %vm299_vm6 = vcmp.lt.s32.totalorder (!%p188_p2), %v932_v6, 31  ;;  %vm306_vm7 = vcmp.lt.s32.totalorder (!%p188_p2), %v932_v6, 15 }
   0xb   : > { %v239_v11 = vand.u32 (!%p188_p2), 15, %v227_v7  ;;  %vm939_vm3 = vcmp.lt.s32.totalorder (!%p188_p2), %v232_v10, 1  ;;  %vm980_vm8 = vcmp.lt.s32.totalorder (!%p188_p2), %v232_v10, 15  ;;  %vm342_vm10 = vcmp.lt.s32.totalorder (!%p188_p2), %v932_v6, 127 }
   0xc   : > { %vm370_vm11 = vcmp.lt.s32.totalorder (!%p188_p2), %v932_v6, 112  ;;  %vm359_vm12 = vcmp.lt.s32.totalorder (!%p188_p2), %v932_v6, 97  ;;  %vm385_vm13 = vcmp.lt.s32.totalorder (!%p188_p2), %v932_v6, 111 }
   0xd   : > { %s1153_s19 = smov (!%p215_p3, %s742_s19), 1  ;;  %vm943_vm4 = vcmp.lt.s32.totalorder %v239_v11, 1  ;;  %vm984_vm9 = vcmp.lt.s32.totalorder %v239_v11, 15 }
   0xe   : > { %s757_s20 = sshll.u32 %s1153_s19, 3  ;;  %s758_s17 = sshll.u32 %s1153_s19, 4 }
   0xf   : > { %s219_s23 = scalar_lea.vmem %s1138_s0, %s757_s20  ;;  %s224_s22 = scalar_lea.vmem %s1143_s5, %s758_s17 }
  0x10   : > { %v252_v0 = vld [vmem:[%s219_s23] sm:$0xff] }
  0x11   : > { %319 = vrot.lane.b32.xlu1 %v252_v0, %s853_s24  ;;  %336 = vst [vmem:[#allocation2 + $0x20] sm:$0xf] %v252_v0  ;;  %263 = vrot.lane.b32.xlu0 %v252_v0, %s854_s25  ;;  %v254_v1 = vcombine.high %v252_v0, %v252_v0 }
  0x13   : > { %337 = vst [vmem:[#allocation2 + $0x28] sm:$0xf] %v254_v1 }
  0x15   : > { %280 = vrot.lane.b32.xlu0 %v252_v0, %s855_s26  ;;  %321 = vrot.lane.b32.xlu1 %v254_v1, %s853_s24 }
  0x19   : > { %282 = vrot.lane.b32.xlu1 %v254_v1, %s855_s26  ;;  %265 = vrot.lane.b32.xlu0 %v254_v1, %s854_s25 }
  0x1d   : > { %258 = vrot.lane.b32.xlu1 %v254_v1, %s856_s27  ;;  %256 = vrot.lane.b32.xlu0 %v252_v0, %s856_s27 }
  0x21   : > { %297 = vrot.lane.b32.xlu1 %v254_v1, %s857_s28  ;;  %295 = vrot.lane.b32.xlu0 %v252_v0, %s857_s28 }
  0x25   : > { %304 = vrot.lane.b32.xlu1 %v254_v1, %s858_s29  ;;  %302 = vrot.lane.b32.xlu0 %v252_v0, %s858_s29 }
  0x29   : > { %340 = vrot.lane.b32.xlu1 %v254_v1, %s859_s30  ;;  %338 = vrot.lane.b32.xlu0 %v252_v0, %s859_s30 }
  0x2d   : > { %368 = vrot.lane.b32.xlu1 %v254_v1, %s860_s6  ;;  %366 = vrot.lane.b32.xlu0 %v252_v0, %s860_s6 }
  0x31   : > { %357 = vrot.lane.b32.xlu1 %v254_v1, %s861_s7  ;;  %355 = vrot.lane.b32.xlu0 %v252_v0, %s861_s7 }
  0x35   : > { %383 = vrot.lane.b32.xlu1 %v254_v1, %s862_s8  ;;  %381 = vrot.lane.b32.xlu0 %v252_v0, %s862_s8 }
  0x39   : > { %406 = vperm.xlu0 %803, %v403_v3  }
  0x83   : > { %v320_v8 = vpop.permute.xlu1 %319  ;;  %v264_v9 = vpop.permute.xlu0 %263 }
  0x87   : > { %v281_v12 = vpop.permute.xlu0 %280  ;;  %v322_v13 = vpop.permute.xlu1 %321 }
  0x88   : > { %v949_v16 = vsel %vm323_vm0, %v320_v8, %v322_v13  ;;  %v953_v17 = vsel %vm323_vm0, %v322_v13, %v320_v8 }
  0x8b   : > { %v283_v18 = vpop.permute.xlu1 %282  ;;  %v266_v19 = vpop.permute.xlu0 %265 }
  0x8c   : > { %v285_v20 = vsel %vm284_vm1, %v281_v12, %v283_v18  ;;  %v286_v21 = vsel %vm284_vm1, %v283_v18, %v281_v12  ;;  %v268_v22 = vsel %vm267_vm2, %v264_v9, %v266_v19  ;;  %v269_v23 = vsel %vm267_vm2, %v266_v19, %v264_v9 }
  0x8d   : > { %v289_v24 = vrot.slane %v286_v21, 4  ;;  %v290_v25 = vrot.slane %v285_v20, 4  ;;  %v326_v26 = vsel %vm939_vm3, %v949_v16, %v269_v23  ;;  %v327_v27 = vsel %vm943_vm4, %v953_v17, %v268_v22 }
  0x8e   : > { %v330_v28 = vrot.slane %v326_v26, 4  ;;  %v331_v29 = vrot.slane %v327_v27, 4  ;;  %v392_v26 = vld [vmem:[%s1139_s1] sm:$0xff] }
  0x8f   : > { %293 = vst [vmem:[#allocation2] sm:$0xf0] %v289_v24  ;;  %294 = vst [vmem:[#allocation2 + $0x8] sm:$0xf0] %v290_v25  ;;  %v259_v30 = vpop.permute.xlu1 %258  ;;  %v257_v31 = vpop.permute.xlu0 %256 }
  0x90   : > { %334 = vst [vmem:[#allocation2 + $0x10] sm:$0xf0] %v330_v28  ;;  %335 = vst [vmem:[#allocation2 + $0x18] sm:$0xf0] %v331_v29  ;;  %v261_v32 = vsel %vm260_vm5, %v257_v31, %v259_v30  ;;  %v262_v33 = vsel %vm260_vm5, %v259_v30, %v257_v31 }
  0x91   : > { %v276_v34 = vsel %vm939_vm3, %v269_v23, %v262_v33  ;;  %v277_v35 = vsel %vm943_vm4, %v268_v22, %v261_v32 }
  0x92   : > { %278 = vst [vmem:[#allocation2] sm:$0xf] %v276_v34  ;;  %279 = vst [vmem:[#allocation2 + $0x8] sm:$0xf] %v277_v35 }
  0x93   : > { %v298_v36 = vpop.permute.xlu1 %297  ;;  %v296_v37 = vpop.permute.xlu0 %295 }
  0x94   : > { %v300_v42 = vsel %vm299_vm6, %v296_v37, %v298_v36  ;;  %v301_v43 = vsel %vm299_vm6, %v298_v36, %v296_v37  ;;  %v602_v36 = vld [vmem:[%s1142_s4] sm:$0xff] }
  0x97   : > { %v305_v40 = vpop.permute.xlu1 %304  ;;  %v303_v41 = vpop.permute.xlu0 %302 }
  0x98   : > { %v307_v44 = vsel %vm306_vm7, %v303_v41, %v305_v40  ;;  %v308_v45 = vsel %vm306_vm7, %v305_v40, %v303_v41 }
  0x99   : > { %v315_v46 = vsel %vm980_vm8, %v308_v45, %v301_v43  ;;  %v316_v47 = vsel %vm984_vm9, %v307_v44, %v300_v42  ;;  %v394_v60 = vld [vmem:[#allocation2 + $0x8] sm:$0xff]  ;;  %v393_v0 = vld [vmem:[#allocation2] sm:$0xff] }
  0x9a   : > { %317 = vst [vmem:[#allocation2 + $0x10] sm:$0xf] %v315_v46  ;;  %318 = vst [vmem:[#allocation2 + $0x18] sm:$0xf] %v316_v47 }
  0x9b   : > { %v341_v48 = vpop.permute.xlu1 %340  ;;  %v339_v49 = vpop.permute.xlu0 %338 }
  0x9c   : > { %v343_v50 = vsel %vm342_vm10, %v339_v49, %v341_v48  ;;  %v344_v51 = vsel %vm342_vm10, %v341_v48, %v339_v49 }
  0x9d   : > { %v345_v52 = vsel %vm980_vm8, %v343_v50, %v308_v45  ;;  %v346_v53 = vsel %vm984_vm9, %v344_v51, %v307_v44 }
  0x9e   : > { %v349_v54 = vrot.slane %v345_v52, 4  ;;  %v350_v55 = vrot.slane %v346_v53, 4 }
  0x9f   : > { %v369_v56 = vpop.permute.xlu1 %368  ;;  %v367_v57 = vpop.permute.xlu0 %366 }
  0xa0   : > { %353 = vst [vmem:[#allocation2 + $0x20] sm:$0xf0] %v349_v54  ;;  %354 = vst [vmem:[#allocation2 + $0x28] sm:$0xf0] %v350_v55  ;;  %v371_v58 = vsel %vm370_vm11, %v367_v57, %v369_v56  ;;  %v372_v59 = vsel %vm370_vm11, %v369_v56, %v367_v57 }
  0xa1   : > { %v375_v61 = vrot.slane %v371_v58, 4  ;;  %v376_v62 = vrot.slane %v372_v59, 4  ;;  %v396_v63 = vld [vmem:[#allocation2 + $0x18] sm:$0xff]  ;;  %v395_v1 = vld [vmem:[#allocation2 + $0x10] sm:$0xff] }
  0xa2   : > { %v759_v2 = vpack.c.bf16 %v396_v63, %v394_v60  ;;  %v761_v3 = vpack.c.bf16 %v395_v1, %v393_v0 }
  0xa3   : > { %379 = vst [vmem:[#allocation2 + $0x30] sm:$0xf0] %v375_v61  ;;  %380 = vst [vmem:[#allocation2 + $0x38] sm:$0xf0] %v376_v62  ;;  %v358_v4 = vpop.permute.xlu1 %357  ;;  %v356_v5 = vpop.permute.xlu0 %355 }
  0xa4   : > { %v360_v7 = vsel %vm359_vm12, %v356_v5, %v358_v4  ;;  %v361_v8 = vsel %vm359_vm12, %v358_v4, %v356_v5  ;;  %760 = vmatprep.subr.bf16.mxu0 %v759_v2 }
  0xa5   : > { %v362_v9 = vsel %vm939_vm3, %v360_v7, %v949_v16  ;;  %v363_v10 = vsel %vm943_vm4, %v361_v8, %v953_v17  ;;  %762 = vmatpush1.bf16.msra.mxu0 %v761_v3 }
  0xa6   : > { %364 = vst [vmem:[#allocation2 + $0x30] sm:$0xf] %v362_v9  ;;  %365 = vst [vmem:[#allocation2 + $0x38] sm:$0xf] %v363_v10 }
  0xa7   : > { %v384_v11 = vpop.permute.xlu1 %383  ;;  %v382_v12 = vpop.permute.xlu0 %381  ;;  %v398_v17 = vld [vmem:[#allocation2 + $0x28] sm:$0xff]  ;;  %v397_v21 = vld [vmem:[#allocation2 + $0x20] sm:$0xff] }
  0xa8   : > { %v386_v13 = vsel %vm385_vm13, %v382_v12, %v384_v11  ;;  %v387_v18 = vsel %vm385_vm13, %v384_v11, %v382_v12 }
  0xa9   : > { %v388_v16 = vsel %vm980_vm8, %v386_v13, %v343_v50  ;;  %v389_v19 = vsel %vm984_vm9, %v387_v18, %v344_v51 }
  0xaa   : > { %390 = vst [vmem:[#allocation2 + $0x40] sm:$0xf] %v388_v16  ;;  %391 = vst [vmem:[#allocation2 + $0x48] sm:$0xf] %v389_v19 }
  0xad   : > { %v400_v20 = vld [vmem:[#allocation2 + $0x38] sm:$0xff]  ;;  %v399_v22 = vld [vmem:[#allocation2 + $0x30] sm:$0xff] }
  0xae   : > { %v763_v23 = vpack.c.bf16 %v400_v20, %v398_v17  ;;  %v765_v24 = vpack.c.bf16 %v399_v22, %v397_v21 }
  0xb0   : > { %764 = vmatprep.subr.bf16.mxu0 %v763_v23 }
  0xb1   : > { %766 = vmatpush1.bf16.msra.mxu0 %v765_v24  ;;  %v402_v25 = vld [vmem:[#allocation2 + $0x48] sm:$0xf]  ;;  %v401_v27 = vld [vmem:[#allocation2 + $0x40] sm:$0xf] }
  0xb2   : > { %751 = vmatprep.subr.msk.mxu0 %vm413_vm14, %v402_v25 }
  0xb5   : > { %752 = vmatpush1.msk.msra.mxu0 %vm413_vm14, %v401_v27 }
  0xb6   : > { %753 = vmatmul.mubr.msk.f32.vlgmr.msra.gmra.mrb[0].mxu0 %vm409_vm15, %v392_v26 }
  0xb8   : > { %v407_v28 = vpop.permute.xlu0 %406 }
 0x189   : > { %v486_v29 = vpop.f32.mrb[0].mxu0 }
 0x18a   : > { %v487_v30 = vadd.f32 %v486_v29, %v407_v28  ;;  %v488_v31 = vpop.f32.mrb[1].mxu0 }
 0x18b   : > { %v489_v32 = vadd.f32 %v488_v31, %v407_v28 }
 0x18c   : > { %v1037_v33 = vmax.f32 %v487_v30, 0.0 }
 0x18d   : > { %v1039_v34 = vmax.f32 %v489_v32, 0.0 }
 0x18f   : > { %v814_v35 = vpack.i.bf16 %v1039_v34, %v1037_v33 }
 0x191   : > { %815 = vrot.lane.b32.xlu0 %v814_v35, %s855_s26  ;;  %805 = vrot.lane.b32.xlu1 %v814_v35, %s856_s27 }
 0x195   : > { %825 = vrot.lane.b32.xlu0 %v814_v35, %s858_s29  ;;  %810 = vrot.lane.b32.xlu1 %v814_v35, %s854_s25 }
 0x199   : > { %545 = vrot.lane.b32.xlu0 %v1037_v33, %s859_s30  ;;  %820 = vrot.lane.b32.xlu1 %v814_v35, %s857_s28 }
 0x19d   : > { %835 = vrot.lane.b32.xlu0 %v814_v35, %s861_s7  ;;  %830 = vrot.lane.b32.xlu1 %v814_v35, %s853_s24 }
 0x1a1   : > { %573 = vrot.lane.b32.xlu0 %v1037_v33, %s862_s8  ;;  %547 = vrot.lane.b32.xlu1 %v1039_v34, %s859_s30 }
 0x1a5   : > { %605 = vperm.xlu0 %803, %v602_v36   ;;  %840 = vrot.lane.b32.xlu1 %v814_v35, %s860_s6 }
 0x1a9   : > { %575 = vrot.lane.b32.xlu1 %v1039_v34, %s862_s8 }
 0x203   : > { %v816_v37 = vpop.permute.xlu0 %815  ;;  %v806_v40 = vpop.permute.xlu1 %805 }
 0x204   : > { %v808_v41 = vunpack.i.h.bf16 %v806_v40  ;;  %v807_v42 = vunpack.i.l.bf16 %v806_v40  ;;  %v818_v43 = vunpack.i.h.bf16 %v816_v37  ;;  %v817_v44 = vunpack.i.l.bf16 %v816_v37 }
 0x206   : > { %v497_v49 = vsel %vm260_vm5, %v807_v42, %v808_v41  ;;  %v498_v51 = vsel %vm260_vm5, %v808_v41, %v807_v42  ;;  %v513_v56 = vsel %vm284_vm1, %v817_v44, %v818_v43  ;;  %v514_v58 = vsel %vm284_vm1, %v818_v43, %v817_v44 }
 0x207   : > { %v826_v45 = vpop.permute.xlu0 %825  ;;  %v811_v46 = vpop.permute.xlu1 %810 }
 0x208   : > { %v813_v47 = vunpack.i.h.bf16 %v811_v46  ;;  %v812_v48 = vunpack.i.l.bf16 %v811_v46  ;;  %v828_v63 = vunpack.i.h.bf16 %v826_v45  ;;  %v827_v0 = vunpack.i.l.bf16 %v826_v45  ;;  %v583_v46 = vld [vmem:[%s1141_s3] sm:$0xff] }
 0x20a   : > { %v503_v50 = vsel %vm267_vm2, %v812_v48, %v813_v47  ;;  %v504_v52 = vsel %vm267_vm2, %v813_v47, %v812_v48  ;;  %v527_v8 = vsel %vm306_vm7, %v827_v0, %v828_v63  ;;  %v528_v9 = vsel %vm306_vm7, %v828_v63, %v827_v0 }
 0x20b   : > { %v546_v53 = vpop.permute.xlu0 %545  ;;  %v821_v54 = vpop.permute.xlu1 %820  ;;  %v506_v55 = vsel %vm943_vm4, %v503_v50, %v497_v49  ;;  %v505_v57 = vsel %vm939_vm3, %v504_v52, %v498_v51 }
 0x20c   : > { %v823_v59 = vunpack.i.h.bf16 %v821_v54  ;;  %v822_v60 = vunpack.i.l.bf16 %v821_v54  ;;  %v767_v61 = vpack.c.bf16 %v513_v56, %v506_v55  ;;  %v769_v62 = vpack.c.bf16 %v514_v58, %v505_v57 }
 0x20e   : > { %768 = vmatprep.subr.bf16.mxu1 %v767_v61  ;;  %v521_v1 = vsel %vm299_vm6, %v822_v60, %v823_v59  ;;  %v522_v2 = vsel %vm299_vm6, %v823_v59, %v822_v60 }
 0x20f   : > { %v831_v3 = vpop.permute.xlu1 %830  ;;  %770 = vmatpush1.bf16.msra.mxu1 %v769_v62  ;;  %v836_v4 = vpop.permute.xlu0 %835  ;;  %v530_v12 = vsel %vm984_vm9, %v527_v8, %v521_v1  ;;  %v529_v13 = vsel %vm980_vm8, %v528_v9, %v522_v2 }
 0x210   : > { %v833_v5 = vunpack.i.h.bf16 %v831_v3  ;;  %v832_v7 = vunpack.i.l.bf16 %v831_v3  ;;  %v838_v18 = vunpack.i.h.bf16 %v836_v4  ;;  %v837_v16 = vunpack.i.l.bf16 %v836_v4 }
 0x212   : > { %v537_v10 = vsel %vm323_vm0, %v832_v7, %v833_v5  ;;  %v538_v11 = vsel %vm323_vm0, %v833_v5, %v832_v7  ;;  %v560_v28 = vsel %vm359_vm12, %v838_v18, %v837_v16  ;;  %v559_v32 = vsel %vm359_vm12, %v837_v16, %v838_v18 }
 0x213   : > { %v548_v19 = vpop.permute.xlu1 %547  ;;  %v540_v17 = vsel %vm943_vm4, %v538_v11, %v503_v50  ;;  %v539_v20 = vsel %vm939_vm3, %v537_v10, %v504_v52  ;;  %v562_v36 = vsel %vm943_vm4, %v560_v28, %v538_v11  ;;  %v574_v40 = vpop.permute.xlu0 %573  ;;  %vm608_vm0 = vcmask 588800  }
 0x214   : > { %v549_v21 = vsel %vm342_vm10, %v546_v53, %v548_v19  ;;  %v550_v22 = vsel %vm342_vm10, %v548_v19, %v546_v53  ;;  %v771_v23 = vpack.c.bf16 %v540_v17, %v530_v12  ;;  %v773_v24 = vpack.c.bf16 %v539_v20, %v529_v13 }
 0x215   : > { %v552_v25 = vsel %vm984_vm9, %v550_v22, %v527_v8  ;;  %v551_v26 = vsel %vm980_vm8, %v549_v21, %v528_v9 }
 0x216   : > { %772 = vmatprep.subr.bf16.mxu1 %v771_v23  ;;  %v775_v27 = vpack.c.bf16 %v552_v25, %v1039_v34  ;;  %v777_v35 = vpack.c.bf16 %v551_v26, %v1037_v33  ;;  %v561_v33 = vsel %vm939_vm3, %v559_v32, %v537_v10 }
 0x217   : > { %v841_v29 = vpop.permute.xlu1 %840  ;;  %774 = vmatpush1.bf16.msra.mxu1 %v773_v24 }
 0x218   : > { %v843_v30 = vunpack.i.h.bf16 %v841_v29  ;;  %v842_v31 = vunpack.i.l.bf16 %v841_v29  ;;  %776 = vmatprep.subr.bf16.mxu1 %v775_v27 }
 0x21a   : > { %v570_v37 = vsel %vm370_vm11, %v843_v30, %v842_v31  ;;  %v569_v34 = vsel %vm370_vm11, %v842_v31, %v843_v30 }
 0x21b   : > { %v576_v41 = vpop.permute.xlu1 %575  ;;  %778 = vmatpush1.bf16.msra.mxu1 %v777_v35  ;;  %v779_v42 = vpack.c.bf16 %v570_v37, %v562_v36  ;;  %v781_v15 = vpack.c.bf16 %v569_v34, %v561_v33 }
 0x21c   : > { %v578_v43 = vsel %vm385_vm13, %v576_v41, %v574_v40  ;;  %v577_v44 = vsel %vm385_vm13, %v574_v40, %v576_v41 }
 0x21d   : > { %780 = vmatprep.subr.bf16.mxu1 %v779_v42  ;;  %v580_v45 = vsel %vm984_vm9, %v578_v43, %v550_v22  ;;  %v579_v47 = vsel %vm980_vm8, %v577_v44, %v549_v21 }
 0x21f   : > { %782 = vmatpush1.bf16.msra.mxu1 %v781_v15 }
 0x220   : > { %628 = vmatprep.subr.mxu1 %v580_v45 }
 0x223   : > { %629 = vmatpush1.msra.mxu1 %v579_v47 }
 0x224   : > { %754 = vmatmul.mubr.msk.f32.vlgmr.msra.gmra.mrb[0].mxu1 %vm608_vm0, %v583_v46  ;;  %v606_v14 = vpop.permute.xlu0 %605 }
 0x2f7   : > { %v678_v48 = vpop.f32.mrb[0].mxu1 }
 0x2f8   : > { %v679_v6 = vadd.f32 %v678_v48, %v606_v14  ;;  %v680_v49 = vpop.f32.mrb[1].mxu1 }
 0x2f9   : > { %v681_v39 = vadd.f32 %v680_v49, %v606_v14 }
 0x2fa   : > { %v683_v50 = vmax.f32 %v679_v6, 0.0 }
 0x2fb   : > { %v684_v51 = vmax.f32 %v681_v39, 0.0 }
 0x2fc   : > { %685 = vst [vmem:[%s224_s22] sm:$0xff] %v683_v50 }
 0x2fd   : > { %686 = vst [vmem:[%s224_s22 + $0x8] sm:$0xff] %v684_v51 }
 0x2fe PF: > { %s15_s18 = sadd.s32 1, %s851_s18  }
 0x2ff   : > { %p12_p4 = scmp.ge.s32.totalorder %s15_s18, 4  }
 0x301   :  { %14 = sbr.rel (!%p12_p4) target bundleno = 1 (0x1), region = 70 }

</bundles_post_ra>
